<compile_context>
chip_gen: v6e
topology: v6e:2x2x1
jax: 0.10.0
libtpu: 0.0.40
codegen_flags: <defaults>
</compile_context>

<pallas_src>
import jax
import jax.numpy as jnp
from jax import lax
from jax.experimental import pallas as pl
from jax.experimental.pallas import tpu as pltpu


def pair_siamese_kernel(f1_ref, f2_ref, w_ref, out_ref):
    """f1_ref / f2_ref: (TB, S, F) feature tiles.  w_ref: (1, F) fused weight row.
    out_ref: (1, TB) lane-dense cosine similarities for this batch tile."""
    tb, s, f = f1_ref.shape
    w = w_ref[...]                                     # (1, F), broadcast along sublanes

    # Fused dense1 -> dense2 -> dense3 (pure linear chain, bias-free):
    #   e[b, s] = <feat[b, s, :], w_eff>   (VPU multiply + XLU lane reduction)
    e1 = jnp.sum(f1_ref[...] * w, axis=-1)             # (TB, S)
    e2 = jnp.sum(f2_ref[...] * w, axis=-1)             # (TB, S)

    # normalize(dim=1, eps=1e-12) then cosine_similarity(dim=1) of unit vectors
    # collapses to:  dot / (max(||e1||, 1e-12) * max(||e2||, 1e-12))
    dot = jnp.sum(e1 * e2, axis=-1)                    # (TB,)
    ss1 = jnp.sum(e1 * e1, axis=-1)                    # ||e1||^2
    ss2 = jnp.sum(e2 * e2, axis=-1)                    # ||e2||^2
    inv1 = lax.rsqrt(jnp.maximum(ss1, 1e-24))          # EUP rsqrt; max(n,1e-12)^2 = max(ss,1e-24)
    inv2 = lax.rsqrt(jnp.maximum(ss2, 1e-24))
    out_ref[...] = jnp.reshape(dot * inv1 * inv2, (1, tb))


def pair_siamese_forward(feat1, feat2, w1, w2, w3, *, batch_tile=512):
    """feat1/feat2: (B, S, feat_dim).  Weights in PyTorch nn.Linear layout:
    w1: (64, feat_dim), w2: (64, 64), w3: (1, 64), all bias-free."""
    B, S, F = feat1.shape
    assert batch_tile % 128 == 0, "batch_tile must be a multiple of 128 (lane-dense output tiling)"

    # Fuse the linear chain once in the wrapper:
    #   feat @ w1.T @ w2.T @ w3.T  ==  feat . (w3 @ w2 @ w1)      -> (1, F) weight row
    w_row = (jnp.asarray(w3, jnp.float32)
             @ jnp.asarray(w2, jnp.float32)
             @ jnp.asarray(w1, jnp.float32))                      # (1, F)

    f1 = feat1.astype(jnp.float32)
    f2 = feat2.astype(jnp.float32)

    if B <= batch_tile:
        tb, bp = B, B                                  # single tile, full-array block
    else:
        tb = batch_tile
        bp = pl.cdiv(B, tb) * tb
        pad = ((0, bp - B), (0, 0), (0, 0))            # zero rows -> cosine 0, sliced off below
        f1 = jnp.pad(f1, pad)
        f2 = jnp.pad(f2, pad)

    out = pl.pallas_call(
        pair_siamese_kernel,
        out_shape=jax.ShapeDtypeStruct((1, bp), jnp.float32),
        grid_spec=pltpu.PrefetchScalarGridSpec(
            num_scalar_prefetch=0,
            grid=(bp // tb,),
            in_specs=[
                pl.BlockSpec((tb, S, F), lambda i: (i, 0, 0)),
                pl.BlockSpec((tb, S, F), lambda i: (i, 0, 0)),
                pl.BlockSpec((1, F), lambda i: (0, 0)),
            ],
            out_specs=pl.BlockSpec((1, tb), lambda i: (0, i)),
        ),
        compiler_params=pltpu.CompilerParams(
            dimension_semantics=("parallel",),          # megacore-shard batch tiles (v7x)
            vmem_limit_bytes=32 * 1024 * 1024,
        ),
    )(f1, f2, w_row)
    return out[0, :B]                                   # (B,)


def _reference(feat1, feat2, w1, w2, w3):
    """Pure-JAX mirror of the PyTorch forward pass (three separate matmuls)."""
    def enc(f):
        e = f @ w1.T
        e = e @ w2.T
        e = e @ w3.T                                    # (B, S, 1)
        e = e[..., 0]                                   # (B, S)
        n = jnp.linalg.norm(e, axis=1, keepdims=True)
        return e / jnp.maximum(n, 1e-12)                # F.normalize(p=2, dim=1)
    e1, e2 = enc(feat1), enc(feat2)
    dot = jnp.sum(e1 * e2, axis=1)
    n1 = jnp.linalg.norm(e1, axis=1)
    n2 = jnp.linalg.norm(e2, axis=1)
    return dot / (jnp.maximum(n1, 1e-8) * jnp.maximum(n2, 1e-8))


if __name__ == "__main__":
    B, S, FEAT_DIM, DENSE_DIM = 2, 8, 32, 64

    key = jax.random.PRNGKey(0)
    k1, k2, kw1, kw2, kw3, k3, k4 = jax.random.split(key, 7)

    feat1 = jax.random.normal(k1, (B, S, FEAT_DIM), dtype=jnp.float32)
    feat2 = jax.random.normal(k2, (B, S, FEAT_DIM), dtype=jnp.float32)

    # Deterministic weights in PyTorch nn.Linear layout (out_features, in_features), bias=False.
    def init_linear(k, out_f, in_f):
        bound = 1.0 / jnp.sqrt(jnp.float32(in_f))
        return jax.random.uniform(k, (out_f, in_f), jnp.float32, -bound, bound)

    w1 = init_linear(kw1, DENSE_DIM, FEAT_DIM)          # dense1
    w2 = init_linear(kw2, DENSE_DIM, DENSE_DIM)         # dense2
    w3 = init_linear(kw3, 1, DENSE_DIM)                 # dense3

    # Small single-tile case.
    out = jax.block_until_ready(pair_siamese_forward(feat1, feat2, w1, w2, w3))
    ref = _reference(feat1, feat2, w1, w2, w3)
    assert out.shape == (B,)
    assert jnp.allclose(out, ref, rtol=1e-4, atol=1e-5), (out, ref)

    # Exercise the tiled (grid > 1) + padded path as well.
    Bt = 260
    ft1 = jax.random.normal(k3, (Bt, S, FEAT_DIM), dtype=jnp.float32)
    ft2 = jax.random.normal(k4, (Bt, S, FEAT_DIM), dtype=jnp.float32)
    out_t = jax.block_until_ready(
        pair_siamese_forward(ft1, ft2, w1, w2, w3, batch_tile=128))
    ref_t = _reference(ft1, ft2, w1, w2, w3)
    assert out_t.shape == (Bt,)
    assert jnp.allclose(out_t, ref_t, rtol=1e-4, atol=1e-5), (out_t, ref_t)

    print("KERNEL_OK")
</pallas_src>

<mosaic_0001>
module attributes {stable_mosaic.version = 11 : i64} {
  func.func @pair_siamese_kernel(%arg0: i32, %arg1: memref<2x8x32xf32, #tpu.memory_space<vmem>>, %arg2: memref<2x8x32xf32, #tpu.memory_space<vmem>>, %arg3: memref<1x32xf32, #tpu.memory_space<vmem>>, %arg4: memref<1x2xf32, #tpu.memory_space<vmem>>) attributes {dimension_semantics = [#tpu.dimension_semantics<parallel>], iteration_bounds = array<i64: 1>, scalar_prefetch = 0 : i64, scratch_operands = 0 : i64, tpu.core_type = #tpu.core_type<tc>, window_params = [{transform_indices = @transform_0, window_bounds = array<i64: 2, 8, 32>}, {transform_indices = @transform_1, window_bounds = array<i64: 2, 8, 32>}, {pipeline_mode = #tpu.pipeline_mode<synchronous>, transform_indices = @transform_2, window_bounds = array<i64: 1, 32>}, {transform_indices = @transform_3, window_bounds = array<i64: 1, 2>}]} {
    %c0 = arith.constant 0 : index
    %c0_0 = arith.constant 0 : index
    %0 = vector.load %arg3[%c0, %c0_0] : memref<1x32xf32, #tpu.memory_space<vmem>>, vector<1x32xf32>
    %c0_1 = arith.constant 0 : index
    %c0_2 = arith.constant 0 : index
    %c0_3 = arith.constant 0 : index
    %1 = vector.load %arg1[%c0_1, %c0_2, %c0_3] : memref<2x8x32xf32, #tpu.memory_space<vmem>>, vector<2x8x32xf32>
    %2 = vector.shape_cast %0 : vector<1x32xf32> to vector<1x1x32xf32>
    %3 = vector.broadcast %2 : vector<1x1x32xf32> to vector<2x8x32xf32>
    %4 = arith.mulf %1, %3 : vector<2x8x32xf32>
    %cst = arith.constant dense<0.000000e+00> : vector<2x8xf32>
    %5 = vector.multi_reduction <add>, %4, %cst [2] : vector<2x8x32xf32> to vector<2x8xf32>
    %c0_4 = arith.constant 0 : index
    %c0_5 = arith.constant 0 : index
    %c0_6 = arith.constant 0 : index
    %6 = vector.load %arg2[%c0_4, %c0_5, %c0_6] : memref<2x8x32xf32, #tpu.memory_space<vmem>>, vector<2x8x32xf32>
    %7 = vector.shape_cast %0 : vector<1x32xf32> to vector<1x1x32xf32>
    %8 = vector.broadcast %7 : vector<1x1x32xf32> to vector<2x8x32xf32>
    %9 = arith.mulf %6, %8 : vector<2x8x32xf32>
    %cst_7 = arith.constant dense<0.000000e+00> : vector<2x8xf32>
    %10 = vector.multi_reduction <add>, %9, %cst_7 [2] : vector<2x8x32xf32> to vector<2x8xf32>
    %11 = arith.mulf %5, %10 : vector<2x8xf32>
    %cst_8 = arith.constant dense<0.000000e+00> : vector<2xf32>
    %12 = vector.multi_reduction <add>, %11, %cst_8 [1] : vector<2x8xf32> to vector<2xf32>
    %13 = arith.mulf %5, %5 : vector<2x8xf32>
    %cst_9 = arith.constant dense<0.000000e+00> : vector<2xf32>
    %14 = vector.multi_reduction <add>, %13, %cst_9 [1] : vector<2x8xf32> to vector<2xf32>
    %15 = arith.mulf %10, %10 : vector<2x8xf32>
    %cst_10 = arith.constant dense<0.000000e+00> : vector<2xf32>
    %16 = vector.multi_reduction <add>, %15, %cst_10 [1] : vector<2x8xf32> to vector<2xf32>
    %cst_11 = arith.constant 1.000000e-24 : f32
    %17 = vector.broadcast %cst_11 : f32 to vector<2xf32>
    %18 = arith.maximumf %14, %17 : vector<2xf32>
    %19 = math.rsqrt %18 : vector<2xf32>
    %cst_12 = arith.constant 1.000000e-24 : f32
    %20 = vector.broadcast %cst_12 : f32 to vector<2xf32>
    %21 = arith.maximumf %16, %20 : vector<2xf32>
    %22 = math.rsqrt %21 : vector<2xf32>
    %23 = arith.mulf %12, %19 : vector<2xf32>
    %24 = arith.mulf %23, %22 : vector<2xf32>
    %25 = vector.shape_cast %24 : vector<2xf32> to vector<1x2xf32>
    %c0_13 = arith.constant 0 : index
    %c0_14 = arith.constant 0 : index
    %26 = vector.load %arg4[%c0_13, %c0_14] : memref<1x2xf32, #tpu.memory_space<vmem>>, vector<1x2xf32>
    tpu.vector_store %arg4[%c0_13, %c0_14], %25 {strides = array<i32>} : memref<1x2xf32, #tpu.memory_space<vmem>>, vector<1x2xf32>,
    return
  }
  func.func @transform_0(%arg0: i32) -> (i32, i32, i32) {
    %c0_i32 = arith.constant 0 : i32
    %c0_i32_0 = arith.constant 0 : i32
    %c0_i32_1 = arith.constant 0 : i32
    return %arg0, %c0_i32, %c0_i32_0 : i32, i32, i32
  }
  func.func @transform_1(%arg0: i32) -> (i32, i32, i32) {
    %c0_i32 = arith.constant 0 : i32
    %c0_i32_0 = arith.constant 0 : i32
    %c0_i32_1 = arith.constant 0 : i32
    return %arg0, %c0_i32, %c0_i32_0 : i32, i32, i32
  }
  func.func @transform_2(%arg0: i32) -> (i32, i32) {
    %c0_i32 = arith.constant 0 : i32
    %c0_i32_0 = arith.constant 0 : i32
    %c0_i32_1 = arith.constant 0 : i32
    return %c0_i32, %c0_i32_0 : i32, i32
  }
  func.func @transform_3(%arg0: i32) -> (i32, i32) {
    %c0_i32 = arith.constant 0 : i32
    %c0_i32_0 = arith.constant 0 : i32
    return %c0_i32, %arg0 : i32, i32
  }
}

</mosaic_0001>

<bundles_post_ra>
// kernel: tpu_custom_call.1
= control target key start
LH: loop header
LB: loop body
LE: loop exit
PB: predicated region body
PF: predicated region fallthrough
CT: control target
= control target key end

     0   :  { %8 = vsyncpa [#allocation3], 0  ;;  %s269_s0 = inlined_call_operand.hbm [shape: f32[2,8,32], index: 0, kind: input, shape index: {}]   ;;  %s270_s1 = inlined_call_operand.hbm [shape: f32[2,8,32], index: 1, kind: input, shape index: {}]   ;;  %s271_s2 = inlined_call_operand.vmem [shape: f32[1,32], index: 2, kind: input, shape index: {}]   ;;  %s272_s3 = inlined_call_operand.hbm [shape: f32[1,2], index: 3, kind: output, shape index: {}]  }
   0x1   :  { %9 = vsyncpa [#allocation6], 0 }
   0x2   :  { %10 = vsyncpa [#allocation4], 0  ;;  %s232_s12 = smov [#allocation2]  }
   0x3   :  { %s16_s13 = sshll.u32 %s232_s12, 4  ;;  %s17_s13 = int_to_ptr.vmem [resolvable:$true] %s16_s13 }
   0x4   :  { %s174_s14 = scalar_lea.vmem %s17_s13, 256  ;;  %p179_p1 = scmp.lt.s32.totalorder %s17_s13, %s17_s13 }
   0x5   :  { %p175_p0 = scmp.ne.s32.totalorder %s17_s13, %s174_s14  ;;  %p180_p2 = scmp.lt.s32.totalorder %s174_s14, %s174_s14 }
   0x7   :  { %p181_p3 = por %p180_p2, %p179_p1 }
   0x9   :  { %p182_p4 = pnand %p181_p3, %p175_p0 }
   0xb   :  { %185 = shalt.err (!%p182_p4)
}
   0xc   :  { %s233_s15 = smov 128   ;;  %s234_s16 = smov 8  }
   0xd   :  { %22 = dma.hbm_to_vmem [thread:$0]  %s269_s0, 256, %s17_s13, [#allocation3], %s233_s15, %s233_s15, %s234_s16  }
   0xe   :  { %s235_s19 = smov [#allocation5]  }
   0xf   :  { %s28_s20 = sshll.u32 %s235_s19, 4  ;;  %s29_s20 = int_to_ptr.vmem [resolvable:$true] %s28_s20 }
  0x10   :  { %s194_s21 = scalar_lea.vmem %s29_s20, 256  ;;  %p199_p6 = scmp.lt.s32.totalorder %s29_s20, %s29_s20 }
  0x11   :  { %p195_p5 = scmp.ne.s32.totalorder %s29_s20, %s194_s21  ;;  %p200_p7 = scmp.lt.s32.totalorder %s194_s21, %s194_s21 }
  0x13   :  { %p201_p8 = por %p200_p7, %p199_p6 }
  0x15   :  { %p202_p9 = pnand %p201_p8, %p195_p5 }
  0x17   :  { %205 = shalt.err (!%p202_p9)
}
  0x18   :  { %34 = dma.hbm_to_vmem [thread:$0]  %s270_s1, 256, %s29_s20, [#allocation6], %s233_s15, %s233_s15, %s234_s16  }
  0x19   :  { %226 = dma.done.wait [#allocation3], 256  }
  0x1a   :  { %227 = vsyncadd [#allocation3], 4294967040 }
  0x1b   :  { %228 = dma.done.wait [#allocation6], 256  }
  0x1c   :  { %229 = vsyncadd [#allocation6], 4294967040  ;;  %v156_v0 = vld [vmem:[%s271_s2] ss:$0 sm:$0xff]  ;;  %vm54_vm0 = vcmask 261120   ;;  %v61_v1 = vld [vmem:[#allocation5] sm:$0xff]  ;;  %v75_v13 = vlaneseq }
  0x1d   :  { %v44_v2 = vld [vmem:[#allocation2] sm:$0xff]  ;;  %v63_v3 = vmul.f32 %v156_v0, %v61_v1  ;;  %v62_v5 = vld [vmem:[#allocation5 + $0x8] sm:$0xff]  ;;  %v45_v6 = vld [vmem:[#allocation2 + $0x8] sm:$0xff]  ;;  %vm85_vm1 = vcmask 1041409   ;;  %vm88_vm2 = vcmask 58368   ;;  %s236_s1 = smov [#allocation7]  }
  0x1e   :  { %v52_v4 = vmul.f32 %v156_v0, %v44_v2  ;;  %v64_v7 = vmul.f32 %v156_v0, %v62_v5  ;;  %v53_v8 = vmul.f32 %v156_v0, %v45_v6  ;;  %v76_v14 = vand.u32 127, %v75_v13  ;;  %s146_s2 = sshll.u32 %s236_s1, 4  ;;  %s147_s2 = int_to_ptr.vmem [resolvable:$true] %s146_s2 }
  0x1f   :  { %v65_v9 = vsel %vm54_vm0, %v63_v3, 0.0  ;;  %v78_v15 = vshrl.u32 %v75_v13, 7  ;;  %vm138_vm3 = vcmask 8192   ;;  %s206_s25 = scalar_lea.vmem %s147_s2, 16  ;;  %s210_s26 = scalar_lea.vmem %s147_s2, 32 }
  0x20   :  { %v55_v10 = vsel %vm54_vm0, %v52_v4, 0.0  ;;  %66 = vadd.xlane.f32.xlu1 %v65_v9  ;;  %v68_v11 = vsel %vm54_vm0, %v64_v7, 0.0  ;;  %v58_v12 = vsel %vm54_vm0, %v53_v8, 0.0  ;;  %p207_p10 = scmp.ne.s32.totalorder %s147_s2, %s206_s25  ;;  %p211_p11 = scmp.lt.s32.totalorder %s147_s2, %s147_s2 }
  0x21   :  { %56 = vadd.xlane.f32.xlu0 %v55_v10  ;;  %v79_v19 = vsub.s32 %v76_v14, %v78_v15  ;;  %p212_p12 = scmp.lt.s32.totalorder %s210_s26, %s206_s25 }
  0x23   :  { %p213_p13 = por %p212_p12, %p211_p11 }
  0x24   :  { %69 = vadd.xlane.f32.xlu1 %v68_v11 }
  0x25   :  { %59 = vadd.xlane.f32.xlu0 %v58_v12  ;;  %p214_p0 = pnand %p213_p13, %p207_p10 }
  0xa9   :  { %v67_v16 = vpop.xlane.xlu1 %66 }
  0xaa   :  { %v57_v17 = vpop.xlane.xlu0 %56  ;;  %v109_v18 = vmul.f32 %v67_v16, %v67_v16 }
  0xab   :  { %v92_v20 = vmul.f32 %v57_v17, %v57_v17  ;;  %v71_v23 = vmul.f32 %v67_v16, %v57_v17 }
  0xac   :  { %v116_v27 = vrot.slane %v109_v18, %v79_v19 }
  0xad   :  { %v70_v21 = vpop.xlane.xlu1 %69  ;;  %v99_v28 = vrot.slane %v92_v20, %v79_v19  ;;  %v80_v32 = vrot.slane %v71_v23, %v79_v19 }
  0xae   :  { %v60_v22 = vpop.xlane.xlu0 %59  ;;  %v110_v24 = vmul.f32 %v70_v21, %v70_v21 }
  0xaf   :  { %v72_v25 = vmul.f32 %v70_v21, %v60_v22  ;;  %v93_v26 = vmul.f32 %v60_v22, %v60_v22 }
  0xb0   :  { %v120_v29 = vrot.slane %v110_v24, %v79_v19 }
  0xb1   :  { %v84_v30 = vrot.slane %v72_v25, %v79_v19  ;;  %v103_v31 = vrot.slane %v93_v26, %v79_v19 }
  0xb2   :  { %v121_v33 = vsel %vm85_vm1, %v120_v29, %v116_v27 }
  0xb3   :  { %v104_v34 = vsel %vm85_vm1, %v103_v31, %v99_v28  ;;  %v123_v35 = vsel %vm88_vm2, %v121_v33, 0.0  ;;  %v86_v37 = vsel %vm85_vm1, %v84_v30, %v80_v32 }
  0xb4   :  { %v106_v36 = vsel %vm88_vm2, %v104_v34, 0.0  ;;  %124 = vadd.xlane.f32.xlu1 %v123_v35  ;;  %v89_v38 = vsel %vm88_vm2, %v86_v37, 0.0 }
  0xb5   :  { %107 = vadd.xlane.f32.xlu0 %v106_v36 }
  0xb9   :  { %90 = vadd.xlane.f32.xlu0 %v89_v38 }
 0x13d   :  { %v125_v39 = vpop.xlane.xlu1 %124 }
 0x13e   :  { %v108_v40 = vpop.xlane.xlu0 %107  ;;  %v128_v42 = vmax.f32 %v125_v39, 1e-24 }
 0x13f   :  { %v126_v41 = vmax.f32 %v108_v40, 1e-24 }
 0x141   :  { %162 = vrsqrt.f32 %v126_v41 }
 0x142   :  { %164 = vrsqrt.f32 %v128_v42  ;;  %v91_v44 = vpop.xlane.xlu0 %90 }
 0x14e   :  { %v163_v43 = vpop.eup %162 }
 0x14f   :  { %v130_v45 = vmul.f32 %v163_v43, %v91_v44  ;;  %v165_v46 = vpop.eup %164 }
 0x151   :  { %v131_v47 = vmul.f32 %v165_v46, %v130_v45 }
 0x153   :  { %v136_v48 = vrot.slane %v131_v47, %v79_v19 }
 0x155   :  { %139 = vst.msk [vmem:[#allocation7] sm:$0x1] %vm138_vm3, %v136_v48 }
 0x156   :  { %217 = shalt.err (!%p214_p0)
}
 0x157   :  { %149 = dma.vmem_to_hbm [thread:$0]  %s147_s2, 16, %s272_s3, [#allocation4]  }
 0x158   :  { %230 = dma.done.wait [#allocation4], 16  }
 0x159   :  { %231 = vsyncadd [#allocation4], 4294967280 }
 0x15a   :  { %153 = vsyncpa [#allocation3], 1 }
 0x15b   :  { %154 = vsyncpa [#allocation6], 1 }
 0x15c   :  { %155 = vsyncpa [#allocation4], 1 }

</bundles_post_ra>
